<compile_context>
chip_gen: v5e
topology: v5e:2x2
jax: 0.10.0
libtpu: 0.0.40
codegen_flags: <defaults>
</compile_context>

<pallas_src>
import functools

import jax
import jax.numpy as jnp
from jax import lax
from jax.experimental import pallas as pl
from jax.experimental.pallas import tpu as pltpu

HIDDEN = 128
N_LAYERS = 5                       # hidden blocks in lower_fc
N_BN_BLOCKS = N_LAYERS + 2         # lower_fc blocks + 2 policy_head blocks
BN_EPS = 1e-5
LANE = 128


def fc_bn_kernel(x_ref, w0_ref, b0_ref, ws_ref, g_ref, beta_ref,
                 wf_ref, bf_ref, o_ref):
    n_rows = x_ref.shape[0]
    inv_n = jnp.float32(1.0 / n_rows)        # trace-time constant

    # First Linear(input_c -> H) + ReLU  (no BN on this one, bias kept).
    # Dot operands in bf16 (MXU-native); accumulate + elementwise in f32.
    h = jnp.dot(x_ref[...].astype(jnp.bfloat16), w0_ref[...],
                preferred_element_type=jnp.float32)
    h = jnp.maximum(h + b0_ref[...], 0.0)

    # n_layers lower_fc blocks + 2 policy_head blocks:
    #   Linear(H,H, bias dropped: cancels under BN) -> BN (batch stats) -> ReLU
    # Static unroll is intentional (short fixed trip count, serial dep chain).
    for i in range(N_BN_BLOCKS):
        z = jnp.dot(h.astype(jnp.bfloat16), ws_ref[i],
                    preferred_element_type=jnp.float32)
        # One-pass batch statistics (biased variance, training-mode BN), f32.
        s1 = jnp.sum(z, axis=0, keepdims=True)                # (1, H)
        s2 = jnp.sum(z * z, axis=0, keepdims=True)            # (1, H)
        mean = s1 * inv_n
        # Clamp: cancellation in s2/N - mean^2 can dip below -eps for large
        # activations -> rsqrt(neg) = NaN.  max() is free VPU insurance.
        var = jnp.maximum(s2 * inv_n - mean * mean, 0.0)
        # Fold gamma/beta into a single per-lane scale/shift (kept as (1,H)).
        scale = g_ref[i] * lax.rsqrt(var + BN_EPS)             # EUP rsqrt
        shift = beta_ref[i] - mean * scale
        h = jnp.maximum(z * scale + shift, 0.0)                # one FMA + ReLU

    # Final Linear(H -> output_c), weight/bias zero-padded to 128 lanes so the
    # matmul N-dim and the output store are lane-dense (unmasked vst).
    y = jnp.dot(h.astype(jnp.bfloat16), wf_ref[...],
                preferred_element_type=jnp.float32) + bf_ref[...]
    o_ref[...] = y.astype(o_ref.dtype)


@jax.jit
def fc_bn_forward_padded(x, params):
    """x: (N, input_c) f32 -> (N, 128) f32, lane-padded policy logits.

    Preferred entry point for fused consumers: columns [output_c:] are exact
    zeros of the padded final Linear; slice lazily where it fuses."""
    n = x.shape[0]
    w0, b0, ws, gammas, betas, wf_pad, bf_pad = params
    out_pad = wf_pad.shape[1]                 # lane-dense padded width (128)
    return pl.pallas_call(
        fc_bn_kernel,
        out_shape=jax.ShapeDtypeStruct((n, out_pad), jnp.float32),
        # Whole arrays fit comfortably in VMEM at these sizes -> single block,
        # no grid; every operand gets a full-array VMEM block.
        in_specs=[pl.BlockSpec(memory_space=pltpu.MemorySpace.VMEM)] * 8,
        out_specs=pl.BlockSpec(memory_space=pltpu.MemorySpace.VMEM),
    )(x, w0, b0, ws, gammas, betas, wf_pad, bf_pad)


@functools.partial(jax.jit, static_argnames=("output_c",))
def fc_bn_forward(x, params, *, output_c):
    """Compatibility wrapper matching the nn.Module output width exactly."""
    return fc_bn_forward_padded(x, params)[:, :output_c]


def init_params(key, input_c, output_c, hidden=HIDDEN):
    """Deterministic synthetic parameters (shapes match the nn.Module).

    - Pre-BN Linear biases are intentionally NOT materialized: under training-
      mode BatchNorm they cancel exactly, so omitting them changes nothing.
    - Matmul weights are stored in bf16 (MXU operand dtype); biases, BN gamma/
      beta stay f32 (all elementwise math runs in f32 in-kernel)."""
    keys = jax.random.split(key, 4 + N_BN_BLOCKS)
    scale_in = 1.0 / jnp.sqrt(jnp.float32(input_c))
    scale_h = 1.0 / jnp.sqrt(jnp.float32(hidden))

    w0 = jax.random.uniform(keys[0], (input_c, hidden), jnp.float32,
                            -scale_in, scale_in)
    b0 = jax.random.uniform(keys[1], (1, hidden), jnp.float32,
                            -scale_in, scale_in)

    ws = []
    for i in range(N_BN_BLOCKS):
        ws.append(jax.random.uniform(keys[2 + i], (hidden, hidden),
                                     jnp.float32, -scale_h, scale_h))
    ws = jnp.stack(ws)                                        # (7, H, H)
    gammas = jnp.ones((N_BN_BLOCKS, 1, hidden), jnp.float32)  # BN weight init
    betas = jnp.zeros((N_BN_BLOCKS, 1, hidden), jnp.float32)  # BN bias init

    wf = jax.random.uniform(keys[-2], (hidden, output_c), jnp.float32,
                            -scale_h, scale_h)
    bf = jax.random.uniform(keys[-1], (1, output_c), jnp.float32,
                            -scale_h, scale_h)

    # Zero-pad final layer to a lane-dense (H, 128)/(1, 128) shape.
    out_pad = max(LANE, ((output_c + LANE - 1) // LANE) * LANE)
    wf_pad = jnp.zeros((hidden, out_pad), jnp.float32).at[:, :output_c].set(wf)
    bf_pad = jnp.zeros((1, out_pad), jnp.float32).at[:, :output_c].set(bf)

    return (w0.astype(jnp.bfloat16), b0,
            ws.astype(jnp.bfloat16), gammas, betas,
            wf_pad.astype(jnp.bfloat16), bf_pad)


if __name__ == "__main__":
    input_c = 32
    output_c = 8
    L = 8                                    # sequence length -> FC batch

    key = jax.random.PRNGKey(0)
    k_obs, k_par = jax.random.split(key)

    # Module contract: obs_ is (N=1, L*input_c); forward does view(-1, input_c).
    obs = jax.random.normal(k_obs, (1, L * input_c), jnp.float32)
    x = obs.reshape(-1, input_c)             # (L, input_c) — FC batch dim is L

    params = init_params(k_par, input_c, output_c)

    out = fc_bn_forward(x, params, output_c=output_c)        # (L, output_c)
    out = out.reshape(-1, output_c)                          # .view(-1, output_c)
    jax.block_until_ready(out)

    assert out.shape == (L, output_c), out.shape
    assert jnp.all(jnp.isfinite(out))
    print("KERNEL_OK")
</pallas_src>

<mosaic_0001>
module attributes {stable_mosaic.version = 11 : i64} {
  func.func @fc_bn_kernel(%arg0: memref<8x32xf32, #tpu.memory_space<vmem>>, %arg1: memref<32x128xbf16, #tpu.memory_space<vmem>>, %arg2: memref<1x128xf32, #tpu.memory_space<vmem>>, %arg3: memref<7x128x128xbf16, #tpu.memory_space<vmem>>, %arg4: memref<7x1x128xf32, #tpu.memory_space<vmem>>, %arg5: memref<7x1x128xf32, #tpu.memory_space<vmem>>, %arg6: memref<128x128xbf16, #tpu.memory_space<vmem>>, %arg7: memref<1x128xf32, #tpu.memory_space<vmem>>, %arg8: memref<8x128xf32, #tpu.memory_space<vmem>>) attributes {dimension_semantics = [], scalar_prefetch = 0 : i64, scratch_operands = 0 : i64, tpu.core_type = #tpu.core_type<tc>} {
    %c0 = arith.constant 0 : index
    %c0_0 = arith.constant 0 : index
    %0 = vector.load %arg0[%c0, %c0_0] : memref<8x32xf32, #tpu.memory_space<vmem>>, vector<8x32xf32>
    %1 = arith.truncf %0 : vector<8x32xf32> to vector<8x32xbf16>
    %c0_1 = arith.constant 0 : index
    %c0_2 = arith.constant 0 : index
    %2 = vector.load %arg1[%c0_1, %c0_2] : memref<32x128xbf16, #tpu.memory_space<vmem>>, vector<32x128xbf16>
    %cst = arith.constant dense<0.000000e+00> : vector<8x128xf32>
    %3 = tpu.matmul %1, %2, %cst {dimension_numbers = #tpu.dot_dimension_numbers<[1], [0], [0], [1], [0, 0, 1, 1], [], []>} : vector<8x32xbf16>, vector<32x128xbf16>, vector<8x128xf32> -> vector<8x128xf32>
    %c0_3 = arith.constant 0 : index
    %c0_4 = arith.constant 0 : index
    %4 = vector.load %arg2[%c0_3, %c0_4] : memref<1x128xf32, #tpu.memory_space<vmem>>, vector<1x128xf32>
    %5 = vector.broadcast %4 : vector<1x128xf32> to vector<8x128xf32>
    %6 = arith.addf %3, %5 : vector<8x128xf32>
    %cst_5 = arith.constant 0.000000e+00 : f32
    %7 = vector.broadcast %cst_5 : f32 to vector<8x128xf32>
    %8 = arith.maximumf %6, %7 : vector<8x128xf32>
    %9 = arith.truncf %8 : vector<8x128xf32> to vector<8x128xbf16>
    %c0_6 = arith.constant 0 : index
    %c0_7 = arith.constant 0 : index
    %c0_8 = arith.constant 0 : index
    %10 = vector.load %arg3[%c0_6, %c0_7, %c0_8] : memref<7x128x128xbf16, #tpu.memory_space<vmem>>, vector<1x128x128xbf16>
    %11 = vector.shape_cast %10 : vector<1x128x128xbf16> to vector<128x128xbf16>
    %cst_9 = arith.constant dense<0.000000e+00> : vector<8x128xf32>
    %12 = tpu.matmul %9, %11, %cst_9 {dimension_numbers = #tpu.dot_dimension_numbers<[1], [0], [0], [1], [0, 0, 1, 1], [], []>} : vector<8x128xbf16>, vector<128x128xbf16>, vector<8x128xf32> -> vector<8x128xf32>
    %cst_10 = arith.constant dense<0.000000e+00> : vector<128xf32>
    %13 = vector.multi_reduction <add>, %12, %cst_10 [0] : vector<8x128xf32> to vector<128xf32>
    %14 = vector.shape_cast %13 : vector<128xf32> to vector<1x128xf32>
    %15 = arith.mulf %12, %12 : vector<8x128xf32>
    %cst_11 = arith.constant dense<0.000000e+00> : vector<128xf32>
    %16 = vector.multi_reduction <add>, %15, %cst_11 [0] : vector<8x128xf32> to vector<128xf32>
    %17 = vector.shape_cast %16 : vector<128xf32> to vector<1x128xf32>
    %cst_12 = arith.constant 1.250000e-01 : f32
    %18 = vector.broadcast %cst_12 : f32 to vector<1x128xf32>
    %19 = arith.mulf %14, %18 : vector<1x128xf32>
    %cst_13 = arith.constant 1.250000e-01 : f32
    %20 = vector.broadcast %cst_13 : f32 to vector<1x128xf32>
    %21 = arith.mulf %17, %20 : vector<1x128xf32>
    %22 = arith.mulf %19, %19 : vector<1x128xf32>
    %23 = arith.subf %21, %22 : vector<1x128xf32>
    %cst_14 = arith.constant 0.000000e+00 : f32
    %24 = vector.broadcast %cst_14 : f32 to vector<1x128xf32>
    %25 = arith.maximumf %23, %24 : vector<1x128xf32>
    %c0_15 = arith.constant 0 : index
    %c0_16 = arith.constant 0 : index
    %c0_17 = arith.constant 0 : index
    %26 = vector.load %arg4[%c0_15, %c0_16, %c0_17] : memref<7x1x128xf32, #tpu.memory_space<vmem>>, vector<1x1x128xf32>
    %27 = vector.shape_cast %26 : vector<1x1x128xf32> to vector<1x128xf32>
    %cst_18 = arith.constant 9.99999974E-6 : f32
    %28 = vector.broadcast %cst_18 : f32 to vector<1x128xf32>
    %29 = arith.addf %25, %28 : vector<1x128xf32>
    %30 = math.rsqrt %29 : vector<1x128xf32>
    %31 = arith.mulf %27, %30 : vector<1x128xf32>
    %c0_19 = arith.constant 0 : index
    %c0_20 = arith.constant 0 : index
    %c0_21 = arith.constant 0 : index
    %32 = vector.load %arg5[%c0_19, %c0_20, %c0_21] : memref<7x1x128xf32, #tpu.memory_space<vmem>>, vector<1x1x128xf32>
    %33 = vector.shape_cast %32 : vector<1x1x128xf32> to vector<1x128xf32>
    %34 = arith.mulf %19, %31 : vector<1x128xf32>
    %35 = arith.subf %33, %34 : vector<1x128xf32>
    %36 = vector.broadcast %31 : vector<1x128xf32> to vector<8x128xf32>
    %37 = arith.mulf %12, %36 : vector<8x128xf32>
    %38 = vector.broadcast %35 : vector<1x128xf32> to vector<8x128xf32>
    %39 = arith.addf %37, %38 : vector<8x128xf32>
    %cst_22 = arith.constant 0.000000e+00 : f32
    %40 = vector.broadcast %cst_22 : f32 to vector<8x128xf32>
    %41 = arith.maximumf %39, %40 : vector<8x128xf32>
    %42 = arith.truncf %41 : vector<8x128xf32> to vector<8x128xbf16>
    %c1 = arith.constant 1 : index
    %c0_23 = arith.constant 0 : index
    %c0_24 = arith.constant 0 : index
    %43 = vector.load %arg3[%c1, %c0_23, %c0_24] : memref<7x128x128xbf16, #tpu.memory_space<vmem>>, vector<1x128x128xbf16>
    %44 = vector.shape_cast %43 : vector<1x128x128xbf16> to vector<128x128xbf16>
    %cst_25 = arith.constant dense<0.000000e+00> : vector<8x128xf32>
    %45 = tpu.matmul %42, %44, %cst_25 {dimension_numbers = #tpu.dot_dimension_numbers<[1], [0], [0], [1], [0, 0, 1, 1], [], []>} : vector<8x128xbf16>, vector<128x128xbf16>, vector<8x128xf32> -> vector<8x128xf32>
    %cst_26 = arith.constant dense<0.000000e+00> : vector<128xf32>
    %46 = vector.multi_reduction <add>, %45, %cst_26 [0] : vector<8x128xf32> to vector<128xf32>
    %47 = vector.shape_cast %46 : vector<128xf32> to vector<1x128xf32>
    %48 = arith.mulf %45, %45 : vector<8x128xf32>
    %cst_27 = arith.constant dense<0.000000e+00> : vector<128xf32>
    %49 = vector.multi_reduction <add>, %48, %cst_27 [0] : vector<8x128xf32> to vector<128xf32>
    %50 = vector.shape_cast %49 : vector<128xf32> to vector<1x128xf32>
    %cst_28 = arith.constant 1.250000e-01 : f32
    %51 = vector.broadcast %cst_28 : f32 to vector<1x128xf32>
    %52 = arith.mulf %47, %51 : vector<1x128xf32>
    %cst_29 = arith.constant 1.250000e-01 : f32
    %53 = vector.broadcast %cst_29 : f32 to vector<1x128xf32>
    %54 = arith.mulf %50, %53 : vector<1x128xf32>
    %55 = arith.mulf %52, %52 : vector<1x128xf32>
    %56 = arith.subf %54, %55 : vector<1x128xf32>
    %cst_30 = arith.constant 0.000000e+00 : f32
    %57 = vector.broadcast %cst_30 : f32 to vector<1x128xf32>
    %58 = arith.maximumf %56, %57 : vector<1x128xf32>
    %c1_31 = arith.constant 1 : index
    %c0_32 = arith.constant 0 : index
    %c0_33 = arith.constant 0 : index
    %59 = vector.load %arg4[%c1_31, %c0_32, %c0_33] : memref<7x1x128xf32, #tpu.memory_space<vmem>>, vector<1x1x128xf32>
    %60 = vector.shape_cast %59 : vector<1x1x128xf32> to vector<1x128xf32>
    %cst_34 = arith.constant 9.99999974E-6 : f32
    %61 = vector.broadcast %cst_34 : f32 to vector<1x128xf32>
    %62 = arith.addf %58, %61 : vector<1x128xf32>
    %63 = math.rsqrt %62 : vector<1x128xf32>
    %64 = arith.mulf %60, %63 : vector<1x128xf32>
    %c1_35 = arith.constant 1 : index
    %c0_36 = arith.constant 0 : index
    %c0_37 = arith.constant 0 : index
    %65 = vector.load %arg5[%c1_35, %c0_36, %c0_37] : memref<7x1x128xf32, #tpu.memory_space<vmem>>, vector<1x1x128xf32>
    %66 = vector.shape_cast %65 : vector<1x1x128xf32> to vector<1x128xf32>
    %67 = arith.mulf %52, %64 : vector<1x128xf32>
    %68 = arith.subf %66, %67 : vector<1x128xf32>
    %69 = vector.broadcast %64 : vector<1x128xf32> to vector<8x128xf32>
    %70 = arith.mulf %45, %69 : vector<8x128xf32>
    %71 = vector.broadcast %68 : vector<1x128xf32> to vector<8x128xf32>
    %72 = arith.addf %70, %71 : vector<8x128xf32>
    %cst_38 = arith.constant 0.000000e+00 : f32
    %73 = vector.broadcast %cst_38 : f32 to vector<8x128xf32>
    %74 = arith.maximumf %72, %73 : vector<8x128xf32>
    %75 = arith.truncf %74 : vector<8x128xf32> to vector<8x128xbf16>
    %c2 = arith.constant 2 : index
    %c0_39 = arith.constant 0 : index
    %c0_40 = arith.constant 0 : index
    %76 = vector.load %arg3[%c2, %c0_39, %c0_40] : memref<7x128x128xbf16, #tpu.memory_space<vmem>>, vector<1x128x128xbf16>
    %77 = vector.shape_cast %76 : vector<1x128x128xbf16> to vector<128x128xbf16>
    %cst_41 = arith.constant dense<0.000000e+00> : vector<8x128xf32>
    %78 = tpu.matmul %75, %77, %cst_41 {dimension_numbers = #tpu.dot_dimension_numbers<[1], [0], [0], [1], [0, 0, 1, 1], [], []>} : vector<8x128xbf16>, vector<128x128xbf16>, vector<8x128xf32> -> vector<8x128xf32>
    %cst_42 = arith.constant dense<0.000000e+00> : vector<128xf32>
    %79 = vector.multi_reduction <add>, %78, %cst_42 [0] : vector<8x128xf32> to vector<128xf32>
    %80 = vector.shape_cast %79 : vector<128xf32> to vector<1x128xf32>
    %81 = arith.mulf %78, %78 : vector<8x128xf32>
    %cst_43 = arith.constant dense<0.000000e+00> : vector<128xf32>
    %82 = vector.multi_reduction <add>, %81, %cst_43 [0] : vector<8x128xf32> to vector<128xf32>
    %83 = vector.shape_cast %82 : vector<128xf32> to vector<1x128xf32>
    %cst_44 = arith.constant 1.250000e-01 : f32
    %84 = vector.broadcast %cst_44 : f32 to vector<1x128xf32>
    %85 = arith.mulf %80, %84 : vector<1x128xf32>
    %cst_45 = arith.constant 1.250000e-01 : f32
    %86 = vector.broadcast %cst_45 : f32 to vector<1x128xf32>
    %87 = arith.mulf %83, %86 : vector<1x128xf32>
    %88 = arith.mulf %85, %85 : vector<1x128xf32>
    %89 = arith.subf %87, %88 : vector<1x128xf32>
    %cst_46 = arith.constant 0.000000e+00 : f32
    %90 = vector.broadcast %cst_46 : f32 to vector<1x128xf32>
    %91 = arith.maximumf %89, %90 : vector<1x128xf32>
    %c2_47 = arith.constant 2 : index
    %c0_48 = arith.constant 0 : index
    %c0_49 = arith.constant 0 : index
    %92 = vector.load %arg4[%c2_47, %c0_48, %c0_49] : memref<7x1x128xf32, #tpu.memory_space<vmem>>, vector<1x1x128xf32>
    %93 = vector.shape_cast %92 : vector<1x1x128xf32> to vector<1x128xf32>
    %cst_50 = arith.constant 9.99999974E-6 : f32
    %94 = vector.broadcast %cst_50 : f32 to vector<1x128xf32>
    %95 = arith.addf %91, %94 : vector<1x128xf32>
    %96 = math.rsqrt %95 : vector<1x128xf32>
    %97 = arith.mulf %93, %96 : vector<1x128xf32>
    %c2_51 = arith.constant 2 : index
    %c0_52 = arith.constant 0 : index
    %c0_53 = arith.constant 0 : index
    %98 = vector.load %arg5[%c2_51, %c0_52, %c0_53] : memref<7x1x128xf32, #tpu.memory_space<vmem>>, vector<1x1x128xf32>
    %99 = vector.shape_cast %98 : vector<1x1x128xf32> to vector<1x128xf32>
    %100 = arith.mulf %85, %97 : vector<1x128xf32>
    %101 = arith.subf %99, %100 : vector<1x128xf32>
    %102 = vector.broadcast %97 : vector<1x128xf32> to vector<8x128xf32>
    %103 = arith.mulf %78, %102 : vector<8x128xf32>
    %104 = vector.broadcast %101 : vector<1x128xf32> to vector<8x128xf32>
    %105 = arith.addf %103, %104 : vector<8x128xf32>
    %cst_54 = arith.constant 0.000000e+00 : f32
    %106 = vector.broadcast %cst_54 : f32 to vector<8x128xf32>
    %107 = arith.maximumf %105, %106 : vector<8x128xf32>
    %108 = arith.truncf %107 : vector<8x128xf32> to vector<8x128xbf16>
    %c3 = arith.constant 3 : index
    %c0_55 = arith.constant 0 : index
    %c0_56 = arith.constant 0 : index
    %109 = vector.load %arg3[%c3, %c0_55, %c0_56] : memref<7x128x128xbf16, #tpu.memory_space<vmem>>, vector<1x128x128xbf16>
    %110 = vector.shape_cast %109 : vector<1x128x128xbf16> to vector<128x128xbf16>
    %cst_57 = arith.constant dense<0.000000e+00> : vector<8x128xf32>
    %111 = tpu.matmul %108, %110, %cst_57 {dimension_numbers = #tpu.dot_dimension_numbers<[1], [0], [0], [1], [0, 0, 1, 1], [], []>} : vector<8x128xbf16>, vector<128x128xbf16>, vector<8x128xf32> -> vector<8x128xf32>
    %cst_58 = arith.constant dense<0.000000e+00> : vector<128xf32>
    %112 = vector.multi_reduction <add>, %111, %cst_58 [0] : vector<8x128xf32> to vector<128xf32>
    %113 = vector.shape_cast %112 : vector<128xf32> to vector<1x128xf32>
    %114 = arith.mulf %111, %111 : vector<8x128xf32>
    %cst_59 = arith.constant dense<0.000000e+00> : vector<128xf32>
    %115 = vector.multi_reduction <add>, %114, %cst_59 [0] : vector<8x128xf32> to vector<128xf32>
    %116 = vector.shape_cast %115 : vector<128xf32> to vector<1x128xf32>
    %cst_60 = arith.constant 1.250000e-01 : f32
    %117 = vector.broadcast %cst_60 : f32 to vector<1x128xf32>
    %118 = arith.mulf %113, %117 : vector<1x128xf32>
    %cst_61 = arith.constant 1.250000e-01 : f32
    %119 = vector.broadcast %cst_61 : f32 to vector<1x128xf32>
    %120 = arith.mulf %116, %119 : vector<1x128xf32>
    %121 = arith.mulf %118, %118 : vector<1x128xf32>
    %122 = arith.subf %120, %121 : vector<1x128xf32>
    %cst_62 = arith.constant 0.000000e+00 : f32
    %123 = vector.broadcast %cst_62 : f32 to vector<1x128xf32>
    %124 = arith.maximumf %122, %123 : vector<1x128xf32>
    %c3_63 = arith.constant 3 : index
    %c0_64 = arith.constant 0 : index
    %c0_65 = arith.constant 0 : index
    %125 = vector.load %arg4[%c3_63, %c0_64, %c0_65] : memref<7x1x128xf32, #tpu.memory_space<vmem>>, vector<1x1x128xf32>
    %126 = vector.shape_cast %125 : vector<1x1x128xf32> to vector<1x128xf32>
    %cst_66 = arith.constant 9.99999974E-6 : f32
    %127 = vector.broadcast %cst_66 : f32 to vector<1x128xf32>
    %128 = arith.addf %124, %127 : vector<1x128xf32>
    %129 = math.rsqrt %128 : vector<1x128xf32>
    %130 = arith.mulf %126, %129 : vector<1x128xf32>
    %c3_67 = arith.constant 3 : index
    %c0_68 = arith.constant 0 : index
    %c0_69 = arith.constant 0 : index
    %131 = vector.load %arg5[%c3_67, %c0_68, %c0_69] : memref<7x1x128xf32, #tpu.memory_space<vmem>>, vector<1x1x128xf32>
    %132 = vector.shape_cast %131 : vector<1x1x128xf32> to vector<1x128xf32>
    %133 = arith.mulf %118, %130 : vector<1x128xf32>
    %134 = arith.subf %132, %133 : vector<1x128xf32>
    %135 = vector.broadcast %130 : vector<1x128xf32> to vector<8x128xf32>
    %136 = arith.mulf %111, %135 : vector<8x128xf32>
    %137 = vector.broadcast %134 : vector<1x128xf32> to vector<8x128xf32>
    %138 = arith.addf %136, %137 : vector<8x128xf32>
    %cst_70 = arith.constant 0.000000e+00 : f32
    %139 = vector.broadcast %cst_70 : f32 to vector<8x128xf32>
    %140 = arith.maximumf %138, %139 : vector<8x128xf32>
    %141 = arith.truncf %140 : vector<8x128xf32> to vector<8x128xbf16>
    %c4 = arith.constant 4 : index
    %c0_71 = arith.constant 0 : index
    %c0_72 = arith.constant 0 : index
    %142 = vector.load %arg3[%c4, %c0_71, %c0_72] : memref<7x128x128xbf16, #tpu.memory_space<vmem>>, vector<1x128x128xbf16>
    %143 = vector.shape_cast %142 : vector<1x128x128xbf16> to vector<128x128xbf16>
    %cst_73 = arith.constant dense<0.000000e+00> : vector<8x128xf32>
    %144 = tpu.matmul %141, %143, %cst_73 {dimension_numbers = #tpu.dot_dimension_numbers<[1], [0], [0], [1], [0, 0, 1, 1], [], []>} : vector<8x128xbf16>, vector<128x128xbf16>, vector<8x128xf32> -> vector<8x128xf32>
    %cst_74 = arith.constant dense<0.000000e+00> : vector<128xf32>
    %145 = vector.multi_reduction <add>, %144, %cst_74 [0] : vector<8x128xf32> to vector<128xf32>
    %146 = vector.shape_cast %145 : vector<128xf32> to vector<1x128xf32>
    %147 = arith.mulf %144, %144 : vector<8x128xf32>
    %cst_75 = arith.constant dense<0.000000e+00> : vector<128xf32>
    %148 = vector.multi_reduction <add>, %147, %cst_75 [0] : vector<8x128xf32> to vector<128xf32>
    %149 = vector.shape_cast %148 : vector<128xf32> to vector<1x128xf32>
    %cst_76 = arith.constant 1.250000e-01 : f32
    %150 = vector.broadcast %cst_76 : f32 to vector<1x128xf32>
    %151 = arith.mulf %146, %150 : vector<1x128xf32>
    %cst_77 = arith.constant 1.250000e-01 : f32
    %152 = vector.broadcast %cst_77 : f32 to vector<1x128xf32>
    %153 = arith.mulf %149, %152 : vector<1x128xf32>
    %154 = arith.mulf %151, %151 : vector<1x128xf32>
    %155 = arith.subf %153, %154 : vector<1x128xf32>
    %cst_78 = arith.constant 0.000000e+00 : f32
    %156 = vector.broadcast %cst_78 : f32 to vector<1x128xf32>
    %157 = arith.maximumf %155, %156 : vector<1x128xf32>
    %c4_79 = arith.constant 4 : index
    %c0_80 = arith.constant 0 : index
    %c0_81 = arith.constant 0 : index
    %158 = vector.load %arg4[%c4_79, %c0_80, %c0_81] : memref<7x1x128xf32, #tpu.memory_space<vmem>>, vector<1x1x128xf32>
    %159 = vector.shape_cast %158 : vector<1x1x128xf32> to vector<1x128xf32>
    %cst_82 = arith.constant 9.99999974E-6 : f32
    %160 = vector.broadcast %cst_82 : f32 to vector<1x128xf32>
    %161 = arith.addf %157, %160 : vector<1x128xf32>
    %162 = math.rsqrt %161 : vector<1x128xf32>
    %163 = arith.mulf %159, %162 : vector<1x128xf32>
    %c4_83 = arith.constant 4 : index
    %c0_84 = arith.constant 0 : index
    %c0_85 = arith.constant 0 : index
    %164 = vector.load %arg5[%c4_83, %c0_84, %c0_85] : memref<7x1x128xf32, #tpu.memory_space<vmem>>, vector<1x1x128xf32>
    %165 = vector.shape_cast %164 : vector<1x1x128xf32> to vector<1x128xf32>
    %166 = arith.mulf %151, %163 : vector<1x128xf32>
    %167 = arith.subf %165, %166 : vector<1x128xf32>
    %168 = vector.broadcast %163 : vector<1x128xf32> to vector<8x128xf32>
    %169 = arith.mulf %144, %168 : vector<8x128xf32>
    %170 = vector.broadcast %167 : vector<1x128xf32> to vector<8x128xf32>
    %171 = arith.addf %169, %170 : vector<8x128xf32>
    %cst_86 = arith.constant 0.000000e+00 : f32
    %172 = vector.broadcast %cst_86 : f32 to vector<8x128xf32>
    %173 = arith.maximumf %171, %172 : vector<8x128xf32>
    %174 = arith.truncf %173 : vector<8x128xf32> to vector<8x128xbf16>
    %c5 = arith.constant 5 : index
    %c0_87 = arith.constant 0 : index
    %c0_88 = arith.constant 0 : index
    %175 = vector.load %arg3[%c5, %c0_87, %c0_88] : memref<7x128x128xbf16, #tpu.memory_space<vmem>>, vector<1x128x128xbf16>
    %176 = vector.shape_cast %175 : vector<1x128x128xbf16> to vector<128x128xbf16>
    %cst_89 = arith.constant dense<0.000000e+00> : vector<8x128xf32>
    %177 = tpu.matmul %174, %176, %cst_89 {dimension_numbers = #tpu.dot_dimension_numbers<[1], [0], [0], [1], [0, 0, 1, 1], [], []>} : vector<8x128xbf16>, vector<128x128xbf16>, vector<8x128xf32> -> vector<8x128xf32>
    %cst_90 = arith.constant dense<0.000000e+00> : vector<128xf32>
    %178 = vector.multi_reduction <add>, %177, %cst_90 [0] : vector<8x128xf32> to vector<128xf32>
    %179 = vector.shape_cast %178 : vector<128xf32> to vector<1x128xf32>
    %180 = arith.mulf %177, %177 : vector<8x128xf32>
    %cst_91 = arith.constant dense<0.000000e+00> : vector<128xf32>
    %181 = vector.multi_reduction <add>, %180, %cst_91 [0] : vector<8x128xf32> to vector<128xf32>
    %182 = vector.shape_cast %181 : vector<128xf32> to vector<1x128xf32>
    %cst_92 = arith.constant 1.250000e-01 : f32
    %183 = vector.broadcast %cst_92 : f32 to vector<1x128xf32>
    %184 = arith.mulf %179, %183 : vector<1x128xf32>
    %cst_93 = arith.constant 1.250000e-01 : f32
    %185 = vector.broadcast %cst_93 : f32 to vector<1x128xf32>
    %186 = arith.mulf %182, %185 : vector<1x128xf32>
    %187 = arith.mulf %184, %184 : vector<1x128xf32>
    %188 = arith.subf %186, %187 : vector<1x128xf32>
    %cst_94 = arith.constant 0.000000e+00 : f32
    %189 = vector.broadcast %cst_94 : f32 to vector<1x128xf32>
    %190 = arith.maximumf %188, %189 : vector<1x128xf32>
    %c5_95 = arith.constant 5 : index
    %c0_96 = arith.constant 0 : index
    %c0_97 = arith.constant 0 : index
    %191 = vector.load %arg4[%c5_95, %c0_96, %c0_97] : memref<7x1x128xf32, #tpu.memory_space<vmem>>, vector<1x1x128xf32>
    %192 = vector.shape_cast %191 : vector<1x1x128xf32> to vector<1x128xf32>
    %cst_98 = arith.constant 9.99999974E-6 : f32
    %193 = vector.broadcast %cst_98 : f32 to vector<1x128xf32>
    %194 = arith.addf %190, %193 : vector<1x128xf32>
    %195 = math.rsqrt %194 : vector<1x128xf32>
    %196 = arith.mulf %192, %195 : vector<1x128xf32>
    %c5_99 = arith.constant 5 : index
    %c0_100 = arith.constant 0 : index
    %c0_101 = arith.constant 0 : index
    %197 = vector.load %arg5[%c5_99, %c0_100, %c0_101] : memref<7x1x128xf32, #tpu.memory_space<vmem>>, vector<1x1x128xf32>
    %198 = vector.shape_cast %197 : vector<1x1x128xf32> to vector<1x128xf32>
    %199 = arith.mulf %184, %196 : vector<1x128xf32>
    %200 = arith.subf %198, %199 : vector<1x128xf32>
    %201 = vector.broadcast %196 : vector<1x128xf32> to vector<8x128xf32>
    %202 = arith.mulf %177, %201 : vector<8x128xf32>
    %203 = vector.broadcast %200 : vector<1x128xf32> to vector<8x128xf32>
    %204 = arith.addf %202, %203 : vector<8x128xf32>
    %cst_102 = arith.constant 0.000000e+00 : f32
    %205 = vector.broadcast %cst_102 : f32 to vector<8x128xf32>
    %206 = arith.maximumf %204, %205 : vector<8x128xf32>
    %207 = arith.truncf %206 : vector<8x128xf32> to vector<8x128xbf16>
    %c6 = arith.constant 6 : index
    %c0_103 = arith.constant 0 : index
    %c0_104 = arith.constant 0 : index
    %208 = vector.load %arg3[%c6, %c0_103, %c0_104] : memref<7x128x128xbf16, #tpu.memory_space<vmem>>, vector<1x128x128xbf16>
    %209 = vector.shape_cast %208 : vector<1x128x128xbf16> to vector<128x128xbf16>
    %cst_105 = arith.constant dense<0.000000e+00> : vector<8x128xf32>
    %210 = tpu.matmul %207, %209, %cst_105 {dimension_numbers = #tpu.dot_dimension_numbers<[1], [0], [0], [1], [0, 0, 1, 1], [], []>} : vector<8x128xbf16>, vector<128x128xbf16>, vector<8x128xf32> -> vector<8x128xf32>
    %cst_106 = arith.constant dense<0.000000e+00> : vector<128xf32>
    %211 = vector.multi_reduction <add>, %210, %cst_106 [0] : vector<8x128xf32> to vector<128xf32>
    %212 = vector.shape_cast %211 : vector<128xf32> to vector<1x128xf32>
    %213 = arith.mulf %210, %210 : vector<8x128xf32>
    %cst_107 = arith.constant dense<0.000000e+00> : vector<128xf32>
    %214 = vector.multi_reduction <add>, %213, %cst_107 [0] : vector<8x128xf32> to vector<128xf32>
    %215 = vector.shape_cast %214 : vector<128xf32> to vector<1x128xf32>
    %cst_108 = arith.constant 1.250000e-01 : f32
    %216 = vector.broadcast %cst_108 : f32 to vector<1x128xf32>
    %217 = arith.mulf %212, %216 : vector<1x128xf32>
    %cst_109 = arith.constant 1.250000e-01 : f32
    %218 = vector.broadcast %cst_109 : f32 to vector<1x128xf32>
    %219 = arith.mulf %215, %218 : vector<1x128xf32>
    %220 = arith.mulf %217, %217 : vector<1x128xf32>
    %221 = arith.subf %219, %220 : vector<1x128xf32>
    %cst_110 = arith.constant 0.000000e+00 : f32
    %222 = vector.broadcast %cst_110 : f32 to vector<1x128xf32>
    %223 = arith.maximumf %221, %222 : vector<1x128xf32>
    %c6_111 = arith.constant 6 : index
    %c0_112 = arith.constant 0 : index
    %c0_113 = arith.constant 0 : index
    %224 = vector.load %arg4[%c6_111, %c0_112, %c0_113] : memref<7x1x128xf32, #tpu.memory_space<vmem>>, vector<1x1x128xf32>
    %225 = vector.shape_cast %224 : vector<1x1x128xf32> to vector<1x128xf32>
    %cst_114 = arith.constant 9.99999974E-6 : f32
    %226 = vector.broadcast %cst_114 : f32 to vector<1x128xf32>
    %227 = arith.addf %223, %226 : vector<1x128xf32>
    %228 = math.rsqrt %227 : vector<1x128xf32>
    %229 = arith.mulf %225, %228 : vector<1x128xf32>
    %c6_115 = arith.constant 6 : index
    %c0_116 = arith.constant 0 : index
    %c0_117 = arith.constant 0 : index
    %230 = vector.load %arg5[%c6_115, %c0_116, %c0_117] : memref<7x1x128xf32, #tpu.memory_space<vmem>>, vector<1x1x128xf32>
    %231 = vector.shape_cast %230 : vector<1x1x128xf32> to vector<1x128xf32>
    %232 = arith.mulf %217, %229 : vector<1x128xf32>
    %233 = arith.subf %231, %232 : vector<1x128xf32>
    %234 = vector.broadcast %229 : vector<1x128xf32> to vector<8x128xf32>
    %235 = arith.mulf %210, %234 : vector<8x128xf32>
    %236 = vector.broadcast %233 : vector<1x128xf32> to vector<8x128xf32>
    %237 = arith.addf %235, %236 : vector<8x128xf32>
    %cst_118 = arith.constant 0.000000e+00 : f32
    %238 = vector.broadcast %cst_118 : f32 to vector<8x128xf32>
    %239 = arith.maximumf %237, %238 : vector<8x128xf32>
    %240 = arith.truncf %239 : vector<8x128xf32> to vector<8x128xbf16>
    %c0_119 = arith.constant 0 : index
    %c0_120 = arith.constant 0 : index
    %241 = vector.load %arg6[%c0_119, %c0_120] : memref<128x128xbf16, #tpu.memory_space<vmem>>, vector<128x128xbf16>
    %cst_121 = arith.constant dense<0.000000e+00> : vector<8x128xf32>
    %242 = tpu.matmul %240, %241, %cst_121 {dimension_numbers = #tpu.dot_dimension_numbers<[1], [0], [0], [1], [0, 0, 1, 1], [], []>} : vector<8x128xbf16>, vector<128x128xbf16>, vector<8x128xf32> -> vector<8x128xf32>
    %c0_122 = arith.constant 0 : index
    %c0_123 = arith.constant 0 : index
    %243 = vector.load %arg7[%c0_122, %c0_123] : memref<1x128xf32, #tpu.memory_space<vmem>>, vector<1x128xf32>
    %244 = vector.broadcast %243 : vector<1x128xf32> to vector<8x128xf32>
    %245 = arith.addf %242, %244 : vector<8x128xf32>
    %c0_124 = arith.constant 0 : index
    %c0_125 = arith.constant 0 : index
    %246 = vector.load %arg8[%c0_124, %c0_125] : memref<8x128xf32, #tpu.memory_space<vmem>>, vector<8x128xf32>
    tpu.vector_store %arg8[%c0_124, %c0_125], %245 {strides = array<i32>} : memref<8x128xf32, #tpu.memory_space<vmem>>, vector<8x128xf32>,
    return
  }
}

</mosaic_0001>

<bundles_post_ra>
// kernel: fc_bn_forward_padded.1
= control target key start
LH: loop header
LB: loop body
LE: loop exit
PB: predicated region body
PF: predicated region fallthrough
CT: control target
= control target key end

     0   :  { %13 = vsyncpa [#allocation3], 0  ;;  %s1759_s0 = inlined_call_operand.hbm [shape: f32[8,32], index: 0, kind: input, shape index: {}]   ;;  %s1760_s1 = inlined_call_operand.hbm [shape: bf16[32,128], index: 1, kind: input, shape index: {}]   ;;  %s1761_s2 = inlined_call_operand.vmem [shape: f32[1,128], index: 2, kind: input, shape index: {}]   ;;  %s1762_s3 = inlined_call_operand.hbm [shape: bf16[7,128,128], index: 3, kind: input, shape index: {}]   ;;  %s1763_s4 = inlined_call_operand.hbm [shape: f32[7,1,128], index: 4, kind: input, shape index: {}]   ;;  %s1764_s5 = inlined_call_operand.hbm [shape: f32[7,1,128], index: 5, kind: input, shape index: {}]   ;;  %s1765_s6 = inlined_call_operand.hbm [shape: bf16[128,128], index: 6, kind: input, shape index: {}]   ;;  %s1766_s7 = inlined_call_operand.vmem [shape: f32[1,128], index: 7, kind: input, shape index: {}]   ;;  %s1767_s8 = inlined_call_operand.hbm [shape: f32[8,128], index: 8, kind: output, shape index: {}]  }
   0x1   :  { %14 = vsyncpa [#allocation6], 0 }
   0x2   :  { %15 = vsyncpa [#allocation9], 0 }
   0x3   :  { %16 = vsyncpa [#allocation12], 0  ;;  %s33_s29 = sshll.u32 %s1760_s1, 4  ;;  %s34_s29 = int_to_ptr.hbm [resolvable:$true] %s33_s29 }
   0x4   :  { %17 = vsyncpa [#allocation4], 0  ;;  %s1667_s30 = smov [#allocation5]   ;;  %s61_s12 = sshll.u32 %s1763_s4, 4  ;;  %s62_s12 = int_to_ptr.hbm [resolvable:$true] %s61_s12 }
   0x5   :  { %s35_s9 = sshll.u32 %s1667_s30, 4  ;;  %s1668_s13 = smov 64   ;;  %s36_s9 = int_to_ptr.vmem [resolvable:$true] %s35_s9 }
   0x6   :  { %s1669_s14 = smov 4   ;;  %s1670_s15 = smov [#allocation8]  }
   0x7   :  { %41 = dma.hbm_to_vmem [thread:$0]  %s34_s29, 256, %s36_s9, [#allocation6], %s1668_s13, %s1668_s13, %s1669_s14  }
   0x8   :  { %s63_s16 = sshll.u32 %s1670_s15, 4  ;;  %s1671_s1 = smov 16   ;;  %s64_s16 = int_to_ptr.vmem [resolvable:$true] %s63_s16 }
   0x9   :  { %s1672_s17 = smov 1   ;;  %s23_s20 = sshll.u32 %s1759_s0, 4  ;;  %s24_s20 = int_to_ptr.hbm [resolvable:$true] %s23_s20 }
   0xa   :  { %69 = dma.hbm_to_vmem [thread:$0]  %s62_s12, 112, %s64_s16, [#allocation9], %s1671_s1, %s1671_s1, %s1672_s17  }
   0xb   :  { %s1673_s21 = smov [#allocation2]   ;;  %s48_s24 = sshll.u32 %s1762_s3, 4  ;;  %s49_s24 = int_to_ptr.hbm [resolvable:$true] %s48_s24 }
   0xc   :  { %s25_s4 = sshll.u32 %s1673_s21, 4  ;;  %s1674_s25 = smov [#allocation7]   ;;  %s26_s4 = int_to_ptr.vmem [resolvable:$true] %s25_s4 }
   0xd   :  { %28 = dma.hbm_to_vmem [thread:$0]  %s24_s20, 128, %s26_s4, [#allocation3]  }
   0xe   :  { %s50_s26 = sshll.u32 %s1674_s25, 4  ;;  %s74_s29 = sshll.u32 %s1764_s5, 4  ;;  %s51_s26 = int_to_ptr.vmem [resolvable:$true] %s50_s26  ;;  %s75_s29 = int_to_ptr.hbm [resolvable:$true] %s74_s29 }
   0xf   :  { %56 = dma.hbm_to_vmem [thread:$0]  %s49_s24, 7168, %s51_s26, [#allocation6], %s1668_s13, %s1668_s13, %s1669_s14  }
  0x10   :  { %s87_s9 = sshll.u32 %s1765_s6, 4  ;;  %s1675_s10 = smov [#allocation10]   ;;  %s88_s9 = int_to_ptr.hbm [resolvable:$true] %s87_s9 }
  0x11   :  { %s76_s3 = sshll.u32 %s1675_s10, 4  ;;  %s1676_s11 = smov [#allocation11]   ;;  %s77_s3 = int_to_ptr.vmem [resolvable:$true] %s76_s3 }
  0x12   :  { %82 = dma.hbm_to_vmem [thread:$0]  %s75_s29, 112, %s77_s3, [#allocation9], %s1671_s1, %s1671_s1, %s1672_s17  }
  0x13   :  { %s89_s12 = sshll.u32 %s1676_s11, 4  ;;  %s90_s12 = int_to_ptr.vmem [resolvable:$true] %s89_s12 }
  0x14   :  { %95 = dma.hbm_to_vmem [thread:$0]  %s88_s9, 1024, %s90_s12, [#allocation12], %s1668_s13, %s1668_s13, %s1669_s14  }
  0x15   :  { %1657 = dma.done.wait [#allocation3], 128  }
  0x16   :  { %1658 = vsyncadd [#allocation3], 4294967168 }
  0x17   :  { %1659 = dma.done.wait [#allocation6], 7424  }
  0x18   :  { %1660 = vsyncadd [#allocation6], 4294959872 }
  0x19   :  { %1661 = dma.done.wait [#allocation9], 224  }
  0x1a   :  { %1662 = vsyncadd [#allocation9], 4294967072 }
  0x1b   :  { %1663 = dma.done.wait [#allocation12], 1024  }
  0x1c   :  { %1664 = vsyncadd [#allocation12], 4294966272  ;;  %v1397_v0 = vld [vmem:[#allocation5 + $0x8] sm:$0xff]  ;;  %v1396_v2 = vld [vmem:[#allocation5] sm:$0xff]  ;;  %vm145_vm0 = vcmask 261120   ;;  %s1677_s14 = smov [#allocation13]  }
  0x1d   :  { %v1405_v1 = vld [vmem:[#allocation7 + $0x38] sm:$0xff]  ;;  %155 = vmatpush.bf16.msra.mxu0 %v1397_v0  ;;  %v123_v3 = vld [vmem:[#allocation2] sm:$0xff]  ;;  %v1404_v4 = vld [vmem:[#allocation7 + $0x30] sm:$0xff]  ;;  %s1116_s15 = sshll.u32 %s1677_s14, 4  ;;  %s1118_s17 = sshll.u32 %s1767_s8, 4  ;;  %s1117_s15 = int_to_ptr.vmem [resolvable:$true] %s1116_s15  ;;  %s1119_s17 = int_to_ptr.hbm [resolvable:$true] %s1118_s17 }
  0x1e   :  { %228 = vmatpush.bf16.msra.mxu1 %v1405_v1  ;;  %v124_v5 = vpack.c.bf16 %v123_v3, %v123_v3  ;;  %v1403_v6 = vld [vmem:[#allocation7 + $0x28] sm:$0xff]  ;;  %v1402_v7 = vld [vmem:[#allocation7 + $0x20] sm:$0xff]  ;;  %v1401_v8 = vld [vmem:[#allocation7 + $0x18] sm:$0xff] }
  0x1f   :  { %v1400_v9 = vld [vmem:[#allocation7 + $0x10] sm:$0xff]  ;;  %v1399_v10 = vld [vmem:[#allocation7 + $0x8] sm:$0xff]  ;;  %v1398_v11 = vld [vmem:[#allocation7] sm:$0xff] }
  0x20   :  { %v1473_v12 = vld [vmem:[%s1761_s2] ss:$0 sm:$0xff]  ;;  %v1413_v18 = vld [vmem:[#allocation7 + $0x78] sm:$0xff]  ;;  %v1412_v19 = vld [vmem:[#allocation7 + $0x70] sm:$0xff] }
  0x21   :  { %156 = vmatpush.bf16.msra.mxu0 %v1396_v2  ;;  %350 = vmatpush.bf16.msra.mxu2 %v1413_v18  ;;  %v1411_v20 = vld [vmem:[#allocation7 + $0x68] sm:$0xff]  ;;  %v1410_v21 = vld [vmem:[#allocation7 + $0x60] sm:$0xff]  ;;  %v1409_v22 = vld [vmem:[#allocation7 + $0x58] sm:$0xff] }
  0x22   :  { %229 = vmatpush.bf16.msra.mxu1 %v1404_v4  ;;  %v1408_v26 = vld [vmem:[#allocation7 + $0x50] sm:$0xff]  ;;  %v1407_v31 = vld [vmem:[#allocation7 + $0x48] sm:$0xff]  ;;  %v1406_v37 = vld [vmem:[#allocation7 + $0x40] sm:$0xff] }
  0x23   :  { %v259_v52 = vld [vmem:[#allocation8] sm:$0x1]  ;;  %v272_v56 = vld [vmem:[#allocation10] sm:$0x1]  ;;  %v1421_v1 = vld [vmem:[#allocation7 + $0xb8] sm:$0xff] }
  0x24   :  { %1139 = vmatmul.msk.bf16.vlgmr.msra.gmra.mxu0 %vm145_vm0, %v124_v5  ;;  %474 = vmatpush.bf16.msra.mxu3 %v1421_v1  ;;  %v1420_v2 = vld [vmem:[#allocation7 + $0xb0] sm:$0xff]  ;;  %v1419_v3 = vld [vmem:[#allocation7 + $0xa8] sm:$0xff]  ;;  %v1418_v4 = vld [vmem:[#allocation7 + $0xa0] sm:$0xff] }
  0x25   :  { %351 = vmatpush.bf16.msra.mxu2 %v1412_v19  ;;  %v1417_v5 = vld [vmem:[#allocation7 + $0x98] sm:$0xff]  ;;  %v1424_v1 = vld [vmem:[#allocation7 + $0xd0] sm:$0xff] }
  0x26   :  { %230 = vmatpush.bf16.msra.mxu1 %v1403_v6 }
  0x28   :  { %475 = vmatpush.bf16.msra.mxu3 %v1420_v2 }
  0x29   :  { %352 = vmatpush.bf16.msra.mxu2 %v1411_v20  ;;  %v1414_v20 = vld [vmem:[#allocation7 + $0x80] sm:$0xff] }
  0x2a   :  { %231 = vmatpush.bf16.msra.mxu1 %v1402_v7 }
  0x2c   :  { %476 = vmatpush.bf16.msra.mxu3 %v1419_v3 }
  0x2d   :  { %353 = vmatpush.bf16.msra.mxu2 %v1410_v21 }
  0x2e   :  { %232 = vmatpush.bf16.msra.mxu1 %v1401_v8 }
  0x30   :  { %477 = vmatpush.bf16.msra.mxu3 %v1418_v4 }
  0x31   :  { %354 = vmatpush.bf16.msra.mxu2 %v1409_v22 }
  0x32   :  { %233 = vmatpush.bf16.msra.mxu1 %v1400_v9  ;;  %v1416_v9 = vld [vmem:[#allocation7 + $0x90] sm:$0xff] }
  0x34   :  { %478 = vmatpush.bf16.msra.mxu3 %v1417_v5 }
  0x35   :  { %355 = vmatpush.bf16.msra.mxu2 %v1408_v26 }
  0x36   :  { %234 = vmatpush.bf16.msra.mxu1 %v1399_v10 }
  0x38   :  { %479 = vmatpush.bf16.msra.mxu3 %v1416_v9  ;;  %v1422_v9 = vld [vmem:[#allocation7 + $0xc0] sm:$0xff] }
  0x39   :  { %356 = vmatpush.bf16.msra.mxu2 %v1407_v31 }
  0x3a   :  { %235 = vmatpush.bf16.msra.mxu1 %v1398_v11 }
  0x3d   :  { %357 = vmatpush.bf16.msra.mxu2 %v1406_v37 }
  0xa1   :  { %v158_v13 = vpop.f32.mrf.mxu0 }
  0xa2   :  { %v159_v14 = vadd.f32 %v1473_v12, %v158_v13 }
  0xa4   :  { %v162_v15 = vmax.f32 %v159_v14, 0.0  ;;  %v1415_v14 = vld [vmem:[#allocation7 + $0x88] sm:$0xff] }
  0xa5   :  { %480 = vmatpush.bf16.msra.mxu3 %v1415_v14 }
  0xa6   :  { %v163_v16 = vpack.c.bf16 %v162_v15, %v162_v15 }
  0xa8   :  { %236 = vmatmul.bf16.vlgmr.msra.gmra.mxu1 %v163_v16 }
  0xa9   :  { %v160_v17 = vpop.f32.mrf.mxu0  ;;  %481 = vmatpush.bf16.msra.mxu3 %v1414_v20 }
 0x125   :  { %v237_v23 = vpop.f32.mrf.mxu1 }
 0x126   :  { %v241_v24 = vrot.slane %v237_v23, 4  ;;  %v247_v25 = vmul.f32 %v237_v23, %v237_v23 }
 0x128   :  { %v242_v27 = vadd.f32 %v241_v24, %v237_v23  ;;  %v248_v28 = vrot.slane %v247_v25, 4 }
 0x12a   :  { %v243_v29 = vrot.slane %v242_v27, 2  ;;  %v249_v30 = vadd.f32 %v248_v28, %v247_v25 }
 0x12c   :  { %v244_v32 = vadd.f32 %v243_v29, %v242_v27  ;;  %v250_v33 = vrot.slane %v249_v30, 2 }
 0x12d   :  { %v239_v34 = vpop.f32.mrf.mxu1 }
 0x12e   :  { %v245_v35 = vrot.slane %v244_v32, 1  ;;  %v251_v36 = vadd.f32 %v250_v33, %v249_v30 }
 0x130   :  { %v252_v38 = vrot.slane %v251_v36, 1  ;;  %v246_v39 = vadd.f32 %v245_v35, %v244_v32  ;;  %v382_v35 = vld [vmem:[#allocation8 + $0x1] sm:$0x1] }
 0x132   :  { %v253_v40 = vadd.f32 %v252_v38, %v251_v36  ;;  %v254_v41 = vmul.f32 0.125, %v246_v39  ;;  %v396_v39 = vld [vmem:[#allocation10 + $0x1] sm:$0x1] }
 0x134   :  { %v255_v42 = vmul.f32 0.125, %v253_v40  ;;  %v256_v43 = vmul.f32 %v254_v41, %v254_v41 }
 0x136   :  { %v257_v44 = vsub.f32 %v255_v42, %v256_v43 }
 0x138   :  { %v258_v45 = vmax.f32 %v257_v44, 0.0 }
 0x13a   :  { %v260_v46 = vadd.f32 1e-05, %v258_v45 }
 0x13c   :  { %1475 = vrsqrt.f32 %v260_v46  ;;  %vm267_vm2 = vweird.f32 %v260_v46 }
 0x142   :  { %v1476_v47 = vpop.eup %1475 }
 0x143   :  { %v262_v48 = vmul.f32 %v1476_v47, %v260_v46  ;;  %vm268_vm1 = vweird.f32 %v1476_v47 }
 0x144   :  { %vm269_vm3 = vmor %vm267_vm2, %vm268_vm1 }
 0x145   :  { %v263_v49 = vmul.f32 %v1476_v47, %v262_v48  ;;  %v1429_v48 = vld [vmem:[#allocation7 + $0xf8] sm:$0xff] }
 0x146   :  { %598 = vmatpush.bf16.msrb.mxu0 %v1429_v48  ;;  %v1432_v48 = vld [vmem:[#allocation7 + $0x110] sm:$0xff] }
 0x147   :  { %v264_v50 = vmul.f32 0.5, %v263_v49  ;;  %v1428_v49 = vld [vmem:[#allocation7 + $0xf0] sm:$0xff] }
 0x149   :  { %v265_v51 = vsub.f32 1.5, %v264_v50  ;;  %v1427_v50 = vld [vmem:[#allocation7 + $0xe8] sm:$0xff] }
 0x14a   :  { %599 = vmatpush.bf16.msrb.mxu0 %v1428_v49 }
 0x14b   :  { %v266_v53 = vmul.f32 %v1476_v47, %v265_v51 }
 0x14d   :  { %v270_v54 = vsel %vm269_vm3, %v1476_v47, %v266_v53 }
 0x14e   :  { %v271_v55 = vmul.f32 %v270_v54, %v259_v52  ;;  %600 = vmatpush.bf16.msrb.mxu0 %v1427_v50  ;;  %v1426_v54 = vld [vmem:[#allocation7 + $0xe0] sm:$0xff] }
 0x150   :  { %v273_v57 = vmul.f32 %v271_v55, %v254_v41  ;;  %v276_v58 = vperm.slane %v271_v55, 0 }
 0x152   :  { %v274_v59 = vsub.f32 %v272_v56, %v273_v57  ;;  %v278_v60 = vmul.f32 %v276_v58, %v237_v23  ;;  %601 = vmatpush.bf16.msrb.mxu0 %v1426_v54 }
 0x154   :  { %v280_v61 = vperm.slane %v274_v59, 0  ;;  %v1425_v59 = vld [vmem:[#allocation7 + $0xd8] sm:$0xff] }
 0x156   :  { %v282_v62 = vadd.f32 %v280_v61, %v278_v60  ;;  %602 = vmatpush.bf16.msrb.mxu0 %v1425_v59 }
 0x158   :  { %v283_v63 = vmax.f32 %v282_v62, 0.0 }
 0x15a   :  { %v284_v0 = vpack.c.bf16 %v283_v63, %v283_v63  ;;  %603 = vmatpush.bf16.msrb.mxu0 %v1424_v1  ;;  %v630_v1 = vld [vmem:[#allocation8 + $0x3] sm:$0x1] }
 0x15c   :  { %358 = vmatmul.bf16.vlgmr.msra.gmra.mxu2 %v284_v0 }
 0x1df   :  { %v359_v6 = vpop.f32.mrf.mxu2 }
 0x1e0   :  { %v363_v7 = vrot.slane %v359_v6, 4  ;;  %v369_v8 = vmul.f32 %v359_v6, %v359_v6 }
 0x1e2   :  { %v364_v10 = vadd.f32 %v363_v7, %v359_v6  ;;  %v370_v11 = vrot.slane %v369_v8, 4 }
 0x1e4   :  { %v365_v12 = vrot.slane %v364_v10, 2  ;;  %v371_v13 = vadd.f32 %v370_v11, %v369_v8 }
 0x1e6   :  { %v366_v15 = vadd.f32 %v365_v12, %v364_v10  ;;  %v372_v16 = vrot.slane %v371_v13, 2 }
 0x1e7   :  { %v361_v17 = vpop.f32.mrf.mxu2 }
 0x1e8   :  { %v367_v18 = vrot.slane %v366_v15, 1  ;;  %v373_v19 = vadd.f32 %v372_v16, %v371_v13 }
 0x1ea   :  { %v374_v21 = vrot.slane %v373_v19, 1  ;;  %v368_v22 = vadd.f32 %v367_v18, %v366_v15  ;;  %v506_v18 = vld [vmem:[#allocation8 + $0x2] sm:$0x1] }
 0x1ec   :  { %v375_v23 = vadd.f32 %v374_v21, %v373_v19  ;;  %v376_v24 = vmul.f32 0.125, %v368_v22  ;;  %v520_v22 = vld [vmem:[#allocation10 + $0x2] sm:$0x1] }
 0x1ee   :  { %v377_v25 = vmul.f32 0.125, %v375_v23  ;;  %v378_v26 = vmul.f32 %v376_v24, %v376_v24 }
 0x1f0   :  { %v379_v27 = vsub.f32 %v377_v25, %v378_v26 }
 0x1f2   :  { %v380_v28 = vmax.f32 %v379_v27, 0.0 }
 0x1f4   :  { %v383_v29 = vadd.f32 1e-05, %v380_v28 }
 0x1f6   :  { %1477 = vrsqrt.f32 %v383_v29  ;;  %vm390_vm5 = vweird.f32 %v383_v29 }
 0x1fc   :  { %v1478_v30 = vpop.eup %1477 }
 0x1fd   :  { %v385_v31 = vmul.f32 %v1478_v30, %v383_v29  ;;  %vm391_vm4 = vweird.f32 %v1478_v30 }
 0x1fe   :  { %vm392_vm6 = vmor %vm390_vm5, %vm391_vm4 }
 0x1ff   :  { %v386_v32 = vmul.f32 %v1478_v30, %v385_v31  ;;  %v1437_v31 = vld [vmem:[#allocation7 + $0x138] sm:$0xff] }
 0x200   :  { %722 = vmatpush.bf16.msrb.mxu1 %v1437_v31  ;;  %v1440_v31 = vld [vmem:[#allocation7 + $0x150] sm:$0xff] }
 0x201   :  { %v387_v33 = vmul.f32 0.5, %v386_v32  ;;  %v1436_v32 = vld [vmem:[#allocation7 + $0x130] sm:$0xff] }
 0x203   :  { %v388_v34 = vsub.f32 1.5, %v387_v33  ;;  %v1435_v33 = vld [vmem:[#allocation7 + $0x128] sm:$0xff] }
 0x204   :  { %723 = vmatpush.bf16.msrb.mxu1 %v1436_v32 }
 0x205   :  { %v389_v36 = vmul.f32 %v1478_v30, %v388_v34 }
 0x207   :  { %v393_v37 = vsel %vm392_vm6, %v1478_v30, %v389_v36 }
 0x208   :  { %v394_v38 = vmul.f32 %v393_v37, %v382_v35  ;;  %724 = vmatpush.bf16.msrb.mxu1 %v1435_v33  ;;  %v1434_v37 = vld [vmem:[#allocation7 + $0x120] sm:$0xff] }
 0x20a   :  { %v397_v40 = vmul.f32 %v394_v38, %v376_v24  ;;  %v400_v41 = vperm.slane %v394_v38, 0 }
 0x20c   :  { %v398_v42 = vsub.f32 %v396_v39, %v397_v40  ;;  %v402_v43 = vmul.f32 %v400_v41, %v359_v6  ;;  %v1423_v6 = vld [vmem:[#allocation7 + $0xc8] sm:$0xff]  ;;  %725 = vmatpush.bf16.msrb.mxu1 %v1434_v37 }
 0x20d   :  { %604 = vmatpush.bf16.msrb.mxu0 %v1423_v6 }
 0x20e   :  { %v404_v44 = vperm.slane %v398_v42, 0  ;;  %v1433_v42 = vld [vmem:[#allocation7 + $0x118] sm:$0xff] }
 0x210   :  { %v406_v45 = vadd.f32 %v404_v44, %v402_v43  ;;  %726 = vmatpush.bf16.msrb.mxu1 %v1433_v42 }
 0x211   :  { %605 = vmatpush.bf16.msrb.mxu0 %v1422_v9 }
 0x212   :  { %v407_v46 = vmax.f32 %v406_v45, 0.0 }
 0x214   :  { %v408_v47 = vpack.c.bf16 %v407_v46, %v407_v46  ;;  %727 = vmatpush.bf16.msrb.mxu1 %v1432_v48  ;;  %v754_v48 = vld [vmem:[#allocation8 + $0x4] sm:$0x1] }
 0x216   :  { %482 = vmatmul.bf16.vlgmr.msra.gmra.mxu3 %v408_v47 }
 0x299   :  { %v483_v51 = vpop.f32.mrf.mxu3 }
 0x29a   :  { %v487_v52 = vrot.slane %v483_v51, 4  ;;  %v493_v53 = vmul.f32 %v483_v51, %v483_v51 }
 0x29c   :  { %v488_v55 = vadd.f32 %v487_v52, %v483_v51  ;;  %v494_v56 = vrot.slane %v493_v53, 4 }
 0x29e   :  { %v489_v57 = vrot.slane %v488_v55, 2  ;;  %v495_v58 = vadd.f32 %v494_v56, %v493_v53  ;;  %v1431_v53 = vld [vmem:[#allocation7 + $0x108] sm:$0xff]  ;;  %v1430_v56 = vld [vmem:[#allocation7 + $0x100] sm:$0xff] }
 0x29f   :  { %728 = vmatpush.bf16.msrb.mxu1 %v1431_v53 }
 0x2a0   :  { %v490_v60 = vadd.f32 %v489_v57, %v488_v55  ;;  %v496_v61 = vrot.slane %v495_v58, 2 }
 0x2a1   :  { %v485_v62 = vpop.f32.mrf.mxu3 }
 0x2a2   :  { %v491_v63 = vrot.slane %v490_v60, 1  ;;  %v497_v0 = vadd.f32 %v496_v61, %v495_v58 }
 0x2a3   :  { %729 = vmatpush.bf16.msrb.mxu1 %v1430_v56 }
 0x2a4   :  { %v492_v2 = vadd.f32 %v491_v63, %v490_v60  ;;  %v498_v3 = vrot.slane %v497_v0, 1 }
 0x2a6   :  { %v499_v4 = vadd.f32 %v498_v3, %v497_v0  ;;  %v500_v5 = vmul.f32 0.125, %v492_v2 }
 0x2a8   :  { %v501_v7 = vmul.f32 0.125, %v499_v4  ;;  %v502_v8 = vmul.f32 %v500_v5, %v500_v5 }
 0x2aa   :  { %v503_v10 = vsub.f32 %v501_v7, %v502_v8 }
 0x2ac   :  { %v504_v11 = vmax.f32 %v503_v10, 0.0 }
 0x2ae   :  { %v507_v12 = vadd.f32 1e-05, %v504_v11 }
 0x2b0   :  { %1479 = vrsqrt.f32 %v507_v12  ;;  %vm514_vm8 = vweird.f32 %v507_v12 }
 0x2b6   :  { %v1480_v13 = vpop.eup %1479 }
 0x2b7   :  { %v509_v14 = vmul.f32 %v1480_v13, %v507_v12  ;;  %vm515_vm7 = vweird.f32 %v1480_v13 }
 0x2b8   :  { %vm516_vm9 = vmor %vm514_vm8, %vm515_vm7 }
 0x2b9   :  { %v510_v15 = vmul.f32 %v1480_v13, %v509_v14  ;;  %v1445_v14 = vld [vmem:[#allocation7 + $0x178] sm:$0xff] }
 0x2ba   :  { %846 = vmatpush.bf16.msrb.mxu2 %v1445_v14  ;;  %v1448_v14 = vld [vmem:[#allocation7 + $0x190] sm:$0xff] }
 0x2bb   :  { %v511_v16 = vmul.f32 0.5, %v510_v15  ;;  %v1444_v15 = vld [vmem:[#allocation7 + $0x170] sm:$0xff] }
 0x2bd   :  { %v512_v17 = vsub.f32 1.5, %v511_v16  ;;  %v1443_v16 = vld [vmem:[#allocation7 + $0x168] sm:$0xff] }
 0x2be   :  { %847 = vmatpush.bf16.msrb.mxu2 %v1444_v15 }
 0x2bf   :  { %v513_v19 = vmul.f32 %v1480_v13, %v512_v17 }
 0x2c1   :  { %v517_v20 = vsel %vm516_vm9, %v1480_v13, %v513_v19 }
 0x2c2   :  { %v518_v21 = vmul.f32 %v517_v20, %v506_v18  ;;  %848 = vmatpush.bf16.msrb.mxu2 %v1443_v16  ;;  %v1442_v20 = vld [vmem:[#allocation7 + $0x160] sm:$0xff] }
 0x2c4   :  { %v524_v23 = vperm.slane %v518_v21, 0  ;;  %v521_v24 = vmul.f32 %v518_v21, %v500_v5  ;;  %v644_v5 = vld [vmem:[#allocation10 + $0x3] sm:$0x1] }
 0x2c6   :  { %v522_v25 = vsub.f32 %v520_v22, %v521_v24  ;;  %v526_v26 = vmul.f32 %v524_v23, %v483_v51  ;;  %849 = vmatpush.bf16.msrb.mxu2 %v1442_v20 }
 0x2c8   :  { %v528_v27 = vperm.slane %v522_v25, 0  ;;  %v1441_v25 = vld [vmem:[#allocation7 + $0x158] sm:$0xff] }
 0x2ca   :  { %v530_v28 = vadd.f32 %v528_v27, %v526_v26  ;;  %850 = vmatpush.bf16.msrb.mxu2 %v1441_v25 }
 0x2cc   :  { %v531_v29 = vmax.f32 %v530_v28, 0.0 }
 0x2ce   :  { %v532_v30 = vpack.c.bf16 %v531_v29, %v531_v29  ;;  %851 = vmatpush.bf16.msrb.mxu2 %v1440_v31  ;;  %v878_v31 = vld [vmem:[#allocation8 + $0x5] sm:$0x1] }
 0x2d0   :  { %606 = vmatmul.bf16.vlgmr.msrb.gmra.mxu0 %v532_v30 }
 0x34d   :  { %v607_v34 = vpop.f32.mrf.mxu0 }
 0x34e   :  { %v611_v35 = vrot.slane %v607_v34, 4  ;;  %v617_v36 = vmul.f32 %v607_v34, %v607_v34 }
 0x350   :  { %v612_v38 = vadd.f32 %v611_v35, %v607_v34  ;;  %v618_v39 = vrot.slane %v617_v36, 4 }
 0x352   :  { %v613_v40 = vrot.slane %v612_v38, 2  ;;  %v619_v41 = vadd.f32 %v618_v39, %v617_v36  ;;  %v1439_v36 = vld [vmem:[#allocation7 + $0x148] sm:$0xff]  ;;  %v1438_v39 = vld [vmem:[#allocation7 + $0x140] sm:$0xff] }
 0x353   :  { %852 = vmatpush.bf16.msrb.mxu2 %v1439_v36 }
 0x354   :  { %v614_v43 = vadd.f32 %v613_v40, %v612_v38  ;;  %v620_v44 = vrot.slane %v619_v41, 2 }
 0x355   :  { %v609_v45 = vpop.f32.mrf.mxu0 }
 0x356   :  { %v615_v46 = vrot.slane %v614_v43, 1  ;;  %v621_v47 = vadd.f32 %v620_v44, %v619_v41 }
 0x357   :  { %853 = vmatpush.bf16.msrb.mxu2 %v1438_v39 }
 0x358   :  { %v616_v49 = vadd.f32 %v615_v46, %v614_v43  ;;  %v622_v50 = vrot.slane %v621_v47, 1 }
 0x35a   :  { %v623_v51 = vadd.f32 %v622_v50, %v621_v47  ;;  %v624_v52 = vmul.f32 0.125, %v616_v49 }
 0x35c   :  { %v625_v54 = vmul.f32 0.125, %v623_v51  ;;  %v626_v55 = vmul.f32 %v624_v52, %v624_v52 }
 0x35e   :  { %v627_v57 = vsub.f32 %v625_v54, %v626_v55 }
 0x360   :  { %v628_v58 = vmax.f32 %v627_v57, 0.0 }
 0x362   :  { %v631_v59 = vadd.f32 1e-05, %v628_v58 }
 0x364   :  { %1481 = vrsqrt.f32 %v631_v59  ;;  %vm638_vm11 = vweird.f32 %v631_v59 }
 0x36a   :  { %v1482_v60 = vpop.eup %1481 }
 0x36b   :  { %v633_v61 = vmul.f32 %v1482_v60, %v631_v59  ;;  %vm639_vm10 = vweird.f32 %v1482_v60 }
 0x36c   :  { %vm640_vm12 = vmor %vm638_vm11, %vm639_vm10 }
 0x36d   :  { %v634_v62 = vmul.f32 %v1482_v60, %v633_v61  ;;  %v1453_v61 = vld [vmem:[#allocation7 + $0x1b8] sm:$0xff] }
 0x36e   :  { %970 = vmatpush.bf16.msrb.mxu3 %v1453_v61  ;;  %v1456_v61 = vld [vmem:[#allocation11 + $0x10] sm:$0xff] }
 0x36f   :  { %v635_v63 = vmul.f32 0.5, %v634_v62  ;;  %v1452_v62 = vld [vmem:[#allocation7 + $0x1b0] sm:$0xff] }
 0x371   :  { %v636_v0 = vsub.f32 1.5, %v635_v63  ;;  %v1451_v63 = vld [vmem:[#allocation7 + $0x1a8] sm:$0xff] }
 0x372   :  { %971 = vmatpush.bf16.msrb.mxu3 %v1452_v62 }
 0x373   :  { %v637_v2 = vmul.f32 %v1482_v60, %v636_v0 }
 0x375   :  { %v641_v3 = vsel %vm640_vm12, %v1482_v60, %v637_v2 }
 0x376   :  { %v642_v4 = vmul.f32 %v641_v3, %v630_v1  ;;  %972 = vmatpush.bf16.msrb.mxu3 %v1451_v63  ;;  %v1450_v3 = vld [vmem:[#allocation7 + $0x1a0] sm:$0xff] }
 0x378   :  { %v648_v6 = vperm.slane %v642_v4, 0  ;;  %v645_v7 = vmul.f32 %v642_v4, %v624_v52  ;;  %v768_v52 = vld [vmem:[#allocation10 + $0x4] sm:$0x1] }
 0x37a   :  { %v646_v8 = vsub.f32 %v644_v5, %v645_v7  ;;  %v650_v9 = vmul.f32 %v648_v6, %v607_v34  ;;  %973 = vmatpush.bf16.msrb.mxu3 %v1450_v3 }
 0x37c   :  { %v652_v10 = vperm.slane %v646_v8, 0  ;;  %v1449_v8 = vld [vmem:[#allocation7 + $0x198] sm:$0xff] }
 0x37e   :  { %v654_v11 = vadd.f32 %v652_v10, %v650_v9  ;;  %974 = vmatpush.bf16.msrb.mxu3 %v1449_v8 }
 0x380   :  { %v655_v12 = vmax.f32 %v654_v11, 0.0 }
 0x382   :  { %v656_v13 = vpack.c.bf16 %v655_v12, %v655_v12  ;;  %975 = vmatpush.bf16.msrb.mxu3 %v1448_v14  ;;  %v1002_v14 = vld [vmem:[#allocation8 + $0x6] sm:$0x1] }
 0x384   :  { %730 = vmatmul.bf16.vlgmr.msrb.gmra.mxu1 %v656_v13 }
 0x401   :  { %v731_v17 = vpop.f32.mrf.mxu1 }
 0x402   :  { %v735_v18 = vrot.slane %v731_v17, 4  ;;  %v741_v19 = vmul.f32 %v731_v17, %v731_v17 }
 0x404   :  { %v736_v21 = vadd.f32 %v735_v18, %v731_v17  ;;  %v742_v22 = vrot.slane %v741_v19, 4 }
 0x406   :  { %v737_v23 = vrot.slane %v736_v21, 2  ;;  %v743_v24 = vadd.f32 %v742_v22, %v741_v19  ;;  %v1447_v19 = vld [vmem:[#allocation7 + $0x188] sm:$0xff]  ;;  %v1446_v22 = vld [vmem:[#allocation7 + $0x180] sm:$0xff] }
 0x407   :  { %976 = vmatpush.bf16.msrb.mxu3 %v1447_v19 }
 0x408   :  { %v738_v26 = vadd.f32 %v737_v23, %v736_v21  ;;  %v744_v27 = vrot.slane %v743_v24, 2 }
 0x409   :  { %v733_v28 = vpop.f32.mrf.mxu1 }
 0x40a   :  { %v739_v29 = vrot.slane %v738_v26, 1  ;;  %v745_v30 = vadd.f32 %v744_v27, %v743_v24 }
 0x40b   :  { %977 = vmatpush.bf16.msrb.mxu3 %v1446_v22 }
 0x40c   :  { %v740_v32 = vadd.f32 %v739_v29, %v738_v26  ;;  %v746_v33 = vrot.slane %v745_v30, 1 }
 0x40e   :  { %v747_v34 = vadd.f32 %v746_v33, %v745_v30  ;;  %v748_v35 = vmul.f32 0.125, %v740_v32 }
 0x410   :  { %v749_v37 = vmul.f32 0.125, %v747_v34  ;;  %v750_v38 = vmul.f32 %v748_v35, %v748_v35 }
 0x412   :  { %v751_v40 = vsub.f32 %v749_v37, %v750_v38 }
 0x414   :  { %v752_v41 = vmax.f32 %v751_v40, 0.0 }
 0x416   :  { %v755_v42 = vadd.f32 1e-05, %v752_v41 }
 0x418   :  { %1483 = vrsqrt.f32 %v755_v42  ;;  %vm762_vm14 = vweird.f32 %v755_v42 }
 0x41e   :  { %v1484_v43 = vpop.eup %1483 }
 0x41f   :  { %v757_v44 = vmul.f32 %v1484_v43, %v755_v42  ;;  %vm763_vm13 = vweird.f32 %v1484_v43 }
 0x420   :  { %vm764_vm15 = vmor %vm762_vm14, %vm763_vm13 }
 0x421   :  { %v758_v45 = vmul.f32 %v1484_v43, %v757_v44  ;;  %v1461_v44 = vld [vmem:[#allocation11 + $0x38] sm:$0xff] }
 0x422   :  { %1097 = vmatpush.bf16.msra.mxu0 %v1461_v44 }
 0x423   :  { %v759_v46 = vmul.f32 0.5, %v758_v45  ;;  %v1460_v45 = vld [vmem:[#allocation11 + $0x30] sm:$0xff] }
 0x425   :  { %v760_v47 = vsub.f32 1.5, %v759_v46  ;;  %v1459_v46 = vld [vmem:[#allocation11 + $0x28] sm:$0xff] }
 0x426   :  { %1098 = vmatpush.bf16.msra.mxu0 %v1460_v45 }
 0x427   :  { %v761_v49 = vmul.f32 %v1484_v43, %v760_v47 }
 0x429   :  { %v765_v50 = vsel %vm764_vm15, %v1484_v43, %v761_v49 }
 0x42a   :  { %v766_v51 = vmul.f32 %v765_v50, %v754_v48  ;;  %1099 = vmatpush.bf16.msra.mxu0 %v1459_v46  ;;  %v1458_v50 = vld [vmem:[#allocation11 + $0x20] sm:$0xff] }
 0x42c   :  { %v772_v53 = vperm.slane %v766_v51, 0  ;;  %v769_v54 = vmul.f32 %v766_v51, %v748_v35  ;;  %v892_v35 = vld [vmem:[#allocation10 + $0x5] sm:$0x1] }
 0x42e   :  { %v770_v55 = vsub.f32 %v768_v52, %v769_v54  ;;  %v774_v56 = vmul.f32 %v772_v53, %v731_v17  ;;  %1100 = vmatpush.bf16.msra.mxu0 %v1458_v50 }
 0x430   :  { %v776_v57 = vperm.slane %v770_v55, 0  ;;  %v1457_v55 = vld [vmem:[#allocation11 + $0x18] sm:$0xff] }
 0x432   :  { %v778_v58 = vadd.f32 %v776_v57, %v774_v56  ;;  %1101 = vmatpush.bf16.msra.mxu0 %v1457_v55 }
 0x434   :  { %v779_v59 = vmax.f32 %v778_v58, 0.0 }
 0x436   :  { %v780_v60 = vpack.c.bf16 %v779_v59, %v779_v59  ;;  %1102 = vmatpush.bf16.msra.mxu0 %v1456_v61 }
 0x438   :  { %854 = vmatmul.bf16.vlgmr.msrb.gmra.mxu2 %v780_v60 }
 0x4bb   :  { %v855_v0 = vpop.f32.mrf.mxu2 }
 0x4bc   :  { %v859_v1 = vrot.slane %v855_v0, 4  ;;  %v865_v2 = vmul.f32 %v855_v0, %v855_v0 }
 0x4be   :  { %v860_v4 = vadd.f32 %v859_v1, %v855_v0  ;;  %v866_v5 = vrot.slane %v865_v2, 4 }
 0x4c0   :  { %v861_v6 = vrot.slane %v860_v4, 2  ;;  %v867_v7 = vadd.f32 %v866_v5, %v865_v2  ;;  %v1455_v2 = vld [vmem:[#allocation11 + $0x8] sm:$0xff] }
 0x4c1   :  { %1103 = vmatpush.bf16.msra.mxu0 %v1455_v2 }
 0x4c2   :  { %v862_v9 = vadd.f32 %v861_v6, %v860_v4  ;;  %v868_v10 = vrot.slane %v867_v7, 2  ;;  %v1454_v6 = vld [vmem:[#allocation11] sm:$0xff] }
 0x4c3   :  { %v857_v11 = vpop.f32.mrf.mxu2 }
 0x4c4   :  { %v863_v12 = vrot.slane %v862_v9, 1  ;;  %v869_v13 = vadd.f32 %v868_v10, %v867_v7 }
 0x4c5   :  { %1104 = vmatpush.bf16.msra.mxu0 %v1454_v6 }
 0x4c6   :  { %v864_v15 = vadd.f32 %v863_v12, %v862_v9  ;;  %v870_v16 = vrot.slane %v869_v13, 1 }
 0x4c8   :  { %v871_v17 = vadd.f32 %v870_v16, %v869_v13  ;;  %v872_v18 = vmul.f32 0.125, %v864_v15 }
 0x4ca   :  { %v873_v20 = vmul.f32 0.125, %v871_v17  ;;  %v874_v21 = vmul.f32 %v872_v18, %v872_v18 }
 0x4cc   :  { %v875_v23 = vsub.f32 %v873_v20, %v874_v21 }
 0x4ce   :  { %v876_v24 = vmax.f32 %v875_v23, 0.0 }
 0x4d0   :  { %v879_v25 = vadd.f32 1e-05, %v876_v24 }
 0x4d2   :  { %1485 = vrsqrt.f32 %v879_v25  ;;  %vm886_vm1 = vweird.f32 %v879_v25 }
 0x4d8   :  { %v1486_v26 = vpop.eup %1485 }
 0x4d9   :  { %v881_v27 = vmul.f32 %v1486_v26, %v879_v25  ;;  %vm887_vm0 = vweird.f32 %v1486_v26 }
 0x4da   :  { %vm888_vm2 = vmor %vm886_vm1, %vm887_vm0 }
 0x4db   :  { %v882_v28 = vmul.f32 %v1486_v26, %v881_v27  ;;  %v1474_v27 = vld [vmem:[%s1766_s7] ss:$0 sm:$0xff] }
 0x4dd   :  { %v883_v29 = vmul.f32 0.5, %v882_v28 }
 0x4df   :  { %v884_v30 = vsub.f32 1.5, %v883_v29 }
 0x4e1   :  { %v885_v32 = vmul.f32 %v1486_v26, %v884_v30 }
 0x4e3   :  { %v889_v33 = vsel %vm888_vm2, %v1486_v26, %v885_v32 }
 0x4e4   :  { %v890_v34 = vmul.f32 %v889_v33, %v878_v31 }
 0x4e6   :  { %v896_v36 = vperm.slane %v890_v34, 0  ;;  %v893_v37 = vmul.f32 %v890_v34, %v872_v18  ;;  %v1016_v18 = vld [vmem:[#allocation10 + $0x6] sm:$0x1] }
 0x4e8   :  { %v894_v38 = vsub.f32 %v892_v35, %v893_v37  ;;  %v898_v39 = vmul.f32 %v896_v36, %v855_v0 }
 0x4ea   :  { %v900_v40 = vperm.slane %v894_v38, 0 }
 0x4ec   :  { %v902_v41 = vadd.f32 %v900_v40, %v898_v39 }
 0x4ee   :  { %v903_v42 = vmax.f32 %v902_v41, 0.0 }
 0x4f0   :  { %v904_v43 = vpack.c.bf16 %v903_v42, %v903_v42 }
 0x4f2   :  { %978 = vmatmul.bf16.vlgmr.msrb.gmra.mxu3 %v904_v43 }
 0x575   :  { %v979_v47 = vpop.f32.mrf.mxu3 }
 0x576   :  { %v983_v48 = vrot.slane %v979_v47, 4  ;;  %v989_v49 = vmul.f32 %v979_v47, %v979_v47 }
 0x578   :  { %v984_v51 = vadd.f32 %v983_v48, %v979_v47  ;;  %v990_v52 = vrot.slane %v989_v49, 4 }
 0x57a   :  { %v985_v53 = vrot.slane %v984_v51, 2  ;;  %v991_v54 = vadd.f32 %v990_v52, %v989_v49 }
 0x57c   :  { %v986_v56 = vadd.f32 %v985_v53, %v984_v51  ;;  %v992_v57 = vrot.slane %v991_v54, 2 }
 0x57d   :  { %v981_v58 = vpop.f32.mrf.mxu3 }
 0x57e   :  { %v987_v59 = vrot.slane %v986_v56, 1  ;;  %v993_v60 = vadd.f32 %v992_v57, %v991_v54 }
 0x580   :  { %v988_v62 = vadd.f32 %v987_v59, %v986_v56  ;;  %v994_v63 = vrot.slane %v993_v60, 1 }
 0x582   :  { %v995_v0 = vadd.f32 %v994_v63, %v993_v60  ;;  %v996_v1 = vmul.f32 0.125, %v988_v62 }
 0x584   :  { %v997_v3 = vmul.f32 0.125, %v995_v0  ;;  %v998_v4 = vmul.f32 %v996_v1, %v996_v1 }
 0x586   :  { %v999_v5 = vsub.f32 %v997_v3, %v998_v4 }
 0x588   :  { %v1000_v7 = vmax.f32 %v999_v5, 0.0 }
 0x58a   :  { %v1003_v8 = vadd.f32 1e-05, %v1000_v7 }
 0x58c   :  { %1487 = vrsqrt.f32 %v1003_v8  ;;  %vm1010_vm4 = vweird.f32 %v1003_v8 }
 0x592   :  { %v1488_v9 = vpop.eup %1487 }
 0x593   :  { %v1005_v10 = vmul.f32 %v1488_v9, %v1003_v8  ;;  %vm1011_vm3 = vweird.f32 %v1488_v9 }
 0x594   :  { %vm1012_vm5 = vmor %vm1010_vm4, %vm1011_vm3 }
 0x595   :  { %v1006_v11 = vmul.f32 %v1488_v9, %v1005_v10 }
 0x597   :  { %v1007_v12 = vmul.f32 0.5, %v1006_v11 }
 0x599   :  { %v1008_v13 = vsub.f32 1.5, %v1007_v12 }
 0x59b   :  { %v1009_v15 = vmul.f32 %v1488_v9, %v1008_v13 }
 0x59d   :  { %v1013_v16 = vsel %vm1012_vm5, %v1488_v9, %v1009_v15 }
 0x59e   :  { %v1014_v17 = vmul.f32 %v1013_v16, %v1002_v14 }
 0x5a0   :  { %v1017_v19 = vmul.f32 %v1014_v17, %v996_v1  ;;  %v1020_v20 = vperm.slane %v1014_v17, 0 }
 0x5a2   :  { %v1018_v21 = vsub.f32 %v1016_v18, %v1017_v19  ;;  %v1022_v22 = vmul.f32 %v1020_v20, %v979_v47 }
 0x5a4   :  { %v1024_v23 = vperm.slane %v1018_v21, 0 }
 0x5a6   :  { %v1026_v24 = vadd.f32 %v1024_v23, %v1022_v22 }
 0x5a8   :  { %v1027_v25 = vmax.f32 %v1026_v24, 0.0 }
 0x5aa   :  { %v1028_v26 = vpack.c.bf16 %v1027_v25, %v1027_v25 }
 0x5ac   :  { %1105 = vmatmul.bf16.vlgmr.msra.gmra.mxu0 %v1028_v26 }
 0x629   :  { %v1106_v28 = vpop.f32.mrf.mxu0 }
 0x62a   :  { %v1107_v29 = vadd.f32 %v1474_v27, %v1106_v28 }
 0x62c   :  { %1110 = vst [vmem:[#allocation13] sm:$0xff] %v1107_v29 }
 0x62d   :  { %1121 = dma.vmem_to_hbm [thread:$0]  %s1117_s15, 128, %s1119_s17, [#allocation4]  }
 0x631   :  { %v1108_v30 = vpop.f32.mrf.mxu0 }
 0x632   :  { %1665 = dma.done.wait [#allocation4], 128  }
 0x633   :  { %1666 = vsyncadd [#allocation4], 4294967168 }
 0x634   :  { %1126 = vsyncpa [#allocation3], 1 }
 0x635   :  { %1127 = vsyncpa [#allocation6], 1 }
 0x636   :  { %1128 = vsyncpa [#allocation9], 1 }
 0x637   :  { %1129 = vsyncpa [#allocation12], 1 }
 0x638   :  { %1130 = vsyncpa [#allocation4], 1 }

</bundles_post_ra>
